<compile_context>
chip_gen: v7x
topology: tpu7x:2x2x1
jax: 0.10.0
libtpu: 0.0.40
codegen_flags: <defaults>
</compile_context>

<pallas_src>
import functools

import jax
import jax.numpy as jnp
from jax import lax
from jax.experimental import pallas as pl
from jax.experimental.pallas import tpu as pltpu


def _round_up(x, m):
    return (x + m - 1) // m * m


def _features_linear_kernel_packed(idx_ref, table_ref, bias_ref, out_ref, *,
                                   num_fields):
    """output_dim == 1 path with a lane-dense packed table.

    idx_ref   : SMEM int32 (1, tile_b * F)  -- this tile's (already offset) indices
    table_ref : VMEM (ceil(V/128), 128)     -- packed weights, resident across tiles
    bias_ref  : VMEM f32 (1, 1)             -- resident
    out_ref   : VMEM f32 (tile_b, 1)        -- this tile's output block
    """
    tile_b = out_ref.shape[0]
    lane_iota = lax.broadcasted_iota(jnp.int32, (1, 128), 1)  # hoisted, loop-invariant

    def row_body(b, carry):
        base = b * num_fields
        acc = jnp.zeros((1, 128), jnp.float32)
        for f in range(num_fields):                              # static, small
            g = idx_ref[0, base + f]                             # SMEM scalar read
            row = table_ref[pl.ds(g >> 7, 1), :].astype(jnp.float32)   # (1, 128)
            acc = acc + jnp.where(lane_iota == (g & 127), row, 0.0)    # lane one-hot
        out_ref[pl.ds(b, 1), :] = jnp.sum(acc, axis=1, keepdims=True)  # one XLU reduce
        return carry

    lax.fori_loop(0, tile_b, row_body, 0, unroll=8)
    out_ref[...] = out_ref[...] + bias_ref[...]                  # bias once per tile


def _features_linear_kernel_rows(idx_ref, table_ref, bias_ref, out_ref, *,
                                 num_fields):
    """General output_dim path: per-index (1, D) row gathers from a (V, D) table."""
    tile_b = out_ref.shape[0]

    def row_body(b, carry):
        base = b * num_fields
        acc = table_ref[pl.ds(idx_ref[0, base], 1), :].astype(jnp.float32)
        for f in range(1, num_fields):
            g = idx_ref[0, base + f]
            acc = acc + table_ref[pl.ds(g, 1), :].astype(jnp.float32)
        out_ref[pl.ds(b, 1), :] = acc
        return carry

    lax.fori_loop(0, tile_b, row_body, 0, unroll=8)
    out_ref[...] = out_ref[...] + bias_ref[...]


def features_linear(x, offsets, table, bias, *, tile_b=None):
    """x: (B, F) int; offsets: (F,) int; table: (V, D); bias: (D,) -> (B, D) f32."""
    B, F = x.shape
    V, D = table.shape

    # ---- tile sizing -------------------------------------------------------
    if tile_b is None:
        # Big tiles amortize the ~0.35 us per-grid-step overhead; cap so the
        # double-buffered SMEM index block stays small after [1, N] padding.
        tile_b = min(1024, max(8, (8192 // max(F, 1)) // 8 * 8))
    tile_b = max(8, _round_up(min(tile_b, _round_up(B, 8)), 8))
    # Keep >= 2 tiles when the batch allows so v7x can split the parallel axis.
    if _round_up(B, tile_b) // tile_b < 2 and B > 8:
        tile_b = max(8, _round_up((B + 1) // 2, 8))
    b_pad = _round_up(B, tile_b)
    num_tiles = b_pad // tile_b

    # ---- inputs (offset add hoisted out of the kernel) ----------------------
    idx = x.astype(jnp.int32) + offsets.astype(jnp.int32)[None, :]
    idx = jnp.clip(idx, 0, V - 1)                 # never gather an OOB table row
    idx = jnp.pad(idx, ((0, b_pad - B), (0, 0)))  # pad rows gather row 0, sliced off
    idx_blocks = idx.reshape(num_tiles, tile_b * F)

    bias2d = bias.reshape(1, D).astype(jnp.float32)

    if D == 1:
        rows = pl.cdiv(V, 128)
        flat = jnp.pad(table.reshape(V), (0, rows * 128 - V))
        table_in = flat.reshape(rows, 128)        # keep checkpoint dtype (bf16 stays bf16)
        table_block = (rows, 128)
        table_bytes = _round_up(rows, 8) * 128 * table_in.dtype.itemsize
        kernel = functools.partial(_features_linear_kernel_packed, num_fields=F)
    else:
        table_in = table
        table_block = (V, D)
        table_bytes = _round_up(V, 8) * _round_up(D, 128) * table_in.dtype.itemsize
        kernel = functools.partial(_features_linear_kernel_rows, num_fields=F)

    # ---- VMEM budget (generation aware; no 32 MiB clamp, no double count) ---
    lane_d = _round_up(D, 128)
    out_bytes = 2 * tile_b * lane_d * 4           # double-buffered output tile
    bias_bytes = 8 * lane_d * 4
    vmem_need = table_bytes + out_bytes + bias_bytes + (2 << 20)   # + headroom
    try:
        vmem_cap = int(pltpu.get_tpu_info().vmem_capacity_bytes)
    except Exception:
        vmem_cap = 64 << 20                       # conservative: v7x per-core VMEM
    vmem_budget = int(vmem_cap * 0.85)
    if vmem_need > vmem_budget:
        # TODO(synk): HBM-resident table (memory_space=pl.ANY) + DMA row gathers.
        raise ValueError(
            f"embedding table needs ~{vmem_need} B VMEM, budget is {vmem_budget} B")
    vmem_limit = min(max(vmem_need, 16 << 20), vmem_budget)

    out_padded = pl.pallas_call(
        kernel,
        out_shape=jax.ShapeDtypeStruct((b_pad, D), jnp.float32),
        grid_spec=pltpu.PrefetchScalarGridSpec(
            num_scalar_prefetch=0,
            grid=(num_tiles,),
            in_specs=[
                pl.BlockSpec((1, tile_b * F), lambda i: (i, 0),
                             memory_space=pltpu.MemorySpace.SMEM),  # per-tile indices
                pl.BlockSpec(table_block, lambda i: (0, 0)),        # resident table
                pl.BlockSpec((1, D), lambda i: (0, 0)),             # resident bias
            ],
            out_specs=pl.BlockSpec((tile_b, D), lambda i: (i, 0)),
        ),
        compiler_params=pltpu.CompilerParams(
            dimension_semantics=("parallel",),    # batch tiles independent (megacore on v7x)
            vmem_limit_bytes=vmem_limit,
        ),
    )(idx_blocks, table_in, bias2d)

    return out_padded[:B]


if __name__ == "__main__":
    key = jax.random.PRNGKey(0)
    k_tab, *k_fields = jax.random.split(key, 5)

    # Module config (small, consistent with FeaturesLinear(field_dims, output_dim=1))
    field_dims = (3, 4, 5, 6)
    output_dim = 1
    batch = 2
    num_fields = len(field_dims)
    vocab = sum(field_dims)

    # Deterministic parameters: Embedding ~ N(0,1) (torch default), bias = zeros.
    table = jax.random.normal(k_tab, (vocab, output_dim), dtype=jnp.float32)
    bias = jnp.zeros((output_dim,), dtype=jnp.float32)

    # offsets = (0, *cumsum(field_dims)[:-1])
    offsets = jnp.asarray(
        [0] + list(jnp.cumsum(jnp.asarray(field_dims))[:-1]), dtype=jnp.int32
    )

    # Deterministic per-field categorical indices in [0, field_dims[f])
    cols = [
        jax.random.randint(k_fields[f], (batch, 1), 0, field_dims[f], dtype=jnp.int32)
        for f in range(num_fields)
    ]
    x = jnp.concatenate(cols, axis=1)  # (batch, num_fields) int32

    out = features_linear(x, offsets, table, bias)
    out = jax.block_until_ready(out)

    # Pure-JAX reference for the torch forward pass.
    ref = jnp.take(table, x + offsets[None, :], axis=0).sum(axis=1) + bias[None, :]
    assert out.shape == (batch, output_dim)
    assert jnp.allclose(out, ref, atol=1e-5, rtol=1e-5), (out, ref)

    print("KERNEL_OK")
</pallas_src>

<mosaic_0001>
module attributes {stable_mosaic.version = 11 : i64} {
  func.func @_features_linear_kernel_packed(%arg0: i32, %arg1: memref<1x32xi32, #tpu.memory_space<smem>>, %arg2: memref<1x128xf32, #tpu.memory_space<vmem>>, %arg3: memref<1x1xf32, #tpu.memory_space<vmem>>, %arg4: memref<8x1xf32, #tpu.memory_space<vmem>>) attributes {dimension_semantics = [#tpu.dimension_semantics<parallel>], iteration_bounds = array<i64: 1>, scalar_prefetch = 0 : i64, scratch_operands = 0 : i64, tpu.core_type = #tpu.core_type<tc>, window_params = [{transform_indices = @transform_0, window_bounds = array<i64: 1, 32>}, {pipeline_mode = #tpu.pipeline_mode<synchronous>, transform_indices = @transform_1, window_bounds = array<i64: 1, 128>}, {pipeline_mode = #tpu.pipeline_mode<synchronous>, transform_indices = @transform_2, window_bounds = array<i64: 1, 1>}, {transform_indices = @transform_3, window_bounds = array<i64: 8, 1>}]} {
    %0 = tpu.iota {dimensions = array<i32: 1>} : vector<1x128xi32>
    %c0_i32 = arith.constant 0 : i32
    %c4_i32 = arith.constant 4 : i32
    %1 = arith.muli %c0_i32, %c4_i32 : i32
    %cst = arith.constant 0.000000e+00 : f32
    %2 = vector.broadcast %cst : f32 to vector<1x128xf32>
    %c0_i32_0 = arith.constant 0 : i32
    %3 = arith.addi %1, %c0_i32_0 : i32
    %c0 = arith.constant 0 : index
    %4 = arith.index_cast %3 : i32 to index
    %5 = memref.load %arg1[%c0, %4] : memref<1x32xi32, #tpu.memory_space<smem>>
    %c7_i32 = arith.constant 7 : i32
    %6 = arith.shrsi %5, %c7_i32 : i32
    %7 = arith.index_cast %6 : i32 to index
    %c0_1 = arith.constant 0 : index
    %8 = vector.load %arg2[%7, %c0_1] : memref<1x128xf32, #tpu.memory_space<vmem>>, vector<1x128xf32>
    %c127_i32 = arith.constant 127 : i32
    %9 = arith.andi %5, %c127_i32 : i32
    %10 = vector.broadcast %9 : i32 to vector<1x128xi32>
    %11 = arith.cmpi eq, %0, %10 : vector<1x128xi32>
    %cst_2 = arith.constant 0.000000e+00 : f32
    %12 = vector.broadcast %cst_2 : f32 to vector<1x128xf32>
    %13 = arith.select %11, %8, %12 : vector<1x128xi1>, vector<1x128xf32>
    %14 = arith.addf %2, %13 : vector<1x128xf32>
    %c1_i32 = arith.constant 1 : i32
    %15 = arith.addi %1, %c1_i32 : i32
    %c0_3 = arith.constant 0 : index
    %16 = arith.index_cast %15 : i32 to index
    %17 = memref.load %arg1[%c0_3, %16] : memref<1x32xi32, #tpu.memory_space<smem>>
    %c7_i32_4 = arith.constant 7 : i32
    %18 = arith.shrsi %17, %c7_i32_4 : i32
    %19 = arith.index_cast %18 : i32 to index
    %c0_5 = arith.constant 0 : index
    %20 = vector.load %arg2[%19, %c0_5] : memref<1x128xf32, #tpu.memory_space<vmem>>, vector<1x128xf32>
    %c127_i32_6 = arith.constant 127 : i32
    %21 = arith.andi %17, %c127_i32_6 : i32
    %22 = vector.broadcast %21 : i32 to vector<1x128xi32>
    %23 = arith.cmpi eq, %0, %22 : vector<1x128xi32>
    %cst_7 = arith.constant 0.000000e+00 : f32
    %24 = vector.broadcast %cst_7 : f32 to vector<1x128xf32>
    %25 = arith.select %23, %20, %24 : vector<1x128xi1>, vector<1x128xf32>
    %26 = arith.addf %14, %25 : vector<1x128xf32>
    %c2_i32 = arith.constant 2 : i32
    %27 = arith.addi %1, %c2_i32 : i32
    %c0_8 = arith.constant 0 : index
    %28 = arith.index_cast %27 : i32 to index
    %29 = memref.load %arg1[%c0_8, %28] : memref<1x32xi32, #tpu.memory_space<smem>>
    %c7_i32_9 = arith.constant 7 : i32
    %30 = arith.shrsi %29, %c7_i32_9 : i32
    %31 = arith.index_cast %30 : i32 to index
    %c0_10 = arith.constant 0 : index
    %32 = vector.load %arg2[%31, %c0_10] : memref<1x128xf32, #tpu.memory_space<vmem>>, vector<1x128xf32>
    %c127_i32_11 = arith.constant 127 : i32
    %33 = arith.andi %29, %c127_i32_11 : i32
    %34 = vector.broadcast %33 : i32 to vector<1x128xi32>
    %35 = arith.cmpi eq, %0, %34 : vector<1x128xi32>
    %cst_12 = arith.constant 0.000000e+00 : f32
    %36 = vector.broadcast %cst_12 : f32 to vector<1x128xf32>
    %37 = arith.select %35, %32, %36 : vector<1x128xi1>, vector<1x128xf32>
    %38 = arith.addf %26, %37 : vector<1x128xf32>
    %c3_i32 = arith.constant 3 : i32
    %39 = arith.addi %1, %c3_i32 : i32
    %c0_13 = arith.constant 0 : index
    %40 = arith.index_cast %39 : i32 to index
    %41 = memref.load %arg1[%c0_13, %40] : memref<1x32xi32, #tpu.memory_space<smem>>
    %c7_i32_14 = arith.constant 7 : i32
    %42 = arith.shrsi %41, %c7_i32_14 : i32
    %43 = arith.index_cast %42 : i32 to index
    %c0_15 = arith.constant 0 : index
    %44 = vector.load %arg2[%43, %c0_15] : memref<1x128xf32, #tpu.memory_space<vmem>>, vector<1x128xf32>
    %c127_i32_16 = arith.constant 127 : i32
    %45 = arith.andi %41, %c127_i32_16 : i32
    %46 = vector.broadcast %45 : i32 to vector<1x128xi32>
    %47 = arith.cmpi eq, %0, %46 : vector<1x128xi32>
    %cst_17 = arith.constant 0.000000e+00 : f32
    %48 = vector.broadcast %cst_17 : f32 to vector<1x128xf32>
    %49 = arith.select %47, %44, %48 : vector<1x128xi1>, vector<1x128xf32>
    %50 = arith.addf %38, %49 : vector<1x128xf32>
    %cst_18 = arith.constant dense<0.000000e+00> : vector<1xf32>
    %51 = vector.multi_reduction <add>, %50, %cst_18 [1] : vector<1x128xf32> to vector<1xf32>
    %52 = vector.shape_cast %51 : vector<1xf32> to vector<1x1xf32>
    %53 = arith.index_cast %c0_i32 : i32 to index
    %c0_19 = arith.constant 0 : index
    %54 = vector.load %arg4[%53, %c0_19] : memref<8x1xf32, #tpu.memory_space<vmem>>, vector<1x1xf32>
    tpu.vector_store %arg4[%53, %c0_19], %52 {strides = array<i32>} : memref<8x1xf32, #tpu.memory_space<vmem>>, vector<1x1xf32>,
    %c1_i32_20 = arith.constant 1 : i32
    %c4_i32_21 = arith.constant 4 : i32
    %55 = arith.muli %c1_i32_20, %c4_i32_21 : i32
    %cst_22 = arith.constant 0.000000e+00 : f32
    %56 = vector.broadcast %cst_22 : f32 to vector<1x128xf32>
    %c0_i32_23 = arith.constant 0 : i32
    %57 = arith.addi %55, %c0_i32_23 : i32
    %c0_24 = arith.constant 0 : index
    %58 = arith.index_cast %57 : i32 to index
    %59 = memref.load %arg1[%c0_24, %58] : memref<1x32xi32, #tpu.memory_space<smem>>
    %c7_i32_25 = arith.constant 7 : i32
    %60 = arith.shrsi %59, %c7_i32_25 : i32
    %61 = arith.index_cast %60 : i32 to index
    %c0_26 = arith.constant 0 : index
    %62 = vector.load %arg2[%61, %c0_26] : memref<1x128xf32, #tpu.memory_space<vmem>>, vector<1x128xf32>
    %c127_i32_27 = arith.constant 127 : i32
    %63 = arith.andi %59, %c127_i32_27 : i32
    %64 = vector.broadcast %63 : i32 to vector<1x128xi32>
    %65 = arith.cmpi eq, %0, %64 : vector<1x128xi32>
    %cst_28 = arith.constant 0.000000e+00 : f32
    %66 = vector.broadcast %cst_28 : f32 to vector<1x128xf32>
    %67 = arith.select %65, %62, %66 : vector<1x128xi1>, vector<1x128xf32>
    %68 = arith.addf %56, %67 : vector<1x128xf32>
    %c1_i32_29 = arith.constant 1 : i32
    %69 = arith.addi %55, %c1_i32_29 : i32
    %c0_30 = arith.constant 0 : index
    %70 = arith.index_cast %69 : i32 to index
    %71 = memref.load %arg1[%c0_30, %70] : memref<1x32xi32, #tpu.memory_space<smem>>
    %c7_i32_31 = arith.constant 7 : i32
    %72 = arith.shrsi %71, %c7_i32_31 : i32
    %73 = arith.index_cast %72 : i32 to index
    %c0_32 = arith.constant 0 : index
    %74 = vector.load %arg2[%73, %c0_32] : memref<1x128xf32, #tpu.memory_space<vmem>>, vector<1x128xf32>
    %c127_i32_33 = arith.constant 127 : i32
    %75 = arith.andi %71, %c127_i32_33 : i32
    %76 = vector.broadcast %75 : i32 to vector<1x128xi32>
    %77 = arith.cmpi eq, %0, %76 : vector<1x128xi32>
    %cst_34 = arith.constant 0.000000e+00 : f32
    %78 = vector.broadcast %cst_34 : f32 to vector<1x128xf32>
    %79 = arith.select %77, %74, %78 : vector<1x128xi1>, vector<1x128xf32>
    %80 = arith.addf %68, %79 : vector<1x128xf32>
    %c2_i32_35 = arith.constant 2 : i32
    %81 = arith.addi %55, %c2_i32_35 : i32
    %c0_36 = arith.constant 0 : index
    %82 = arith.index_cast %81 : i32 to index
    %83 = memref.load %arg1[%c0_36, %82] : memref<1x32xi32, #tpu.memory_space<smem>>
    %c7_i32_37 = arith.constant 7 : i32
    %84 = arith.shrsi %83, %c7_i32_37 : i32
    %85 = arith.index_cast %84 : i32 to index
    %c0_38 = arith.constant 0 : index
    %86 = vector.load %arg2[%85, %c0_38] : memref<1x128xf32, #tpu.memory_space<vmem>>, vector<1x128xf32>
    %c127_i32_39 = arith.constant 127 : i32
    %87 = arith.andi %83, %c127_i32_39 : i32
    %88 = vector.broadcast %87 : i32 to vector<1x128xi32>
    %89 = arith.cmpi eq, %0, %88 : vector<1x128xi32>
    %cst_40 = arith.constant 0.000000e+00 : f32
    %90 = vector.broadcast %cst_40 : f32 to vector<1x128xf32>
    %91 = arith.select %89, %86, %90 : vector<1x128xi1>, vector<1x128xf32>
    %92 = arith.addf %80, %91 : vector<1x128xf32>
    %c3_i32_41 = arith.constant 3 : i32
    %93 = arith.addi %55, %c3_i32_41 : i32
    %c0_42 = arith.constant 0 : index
    %94 = arith.index_cast %93 : i32 to index
    %95 = memref.load %arg1[%c0_42, %94] : memref<1x32xi32, #tpu.memory_space<smem>>
    %c7_i32_43 = arith.constant 7 : i32
    %96 = arith.shrsi %95, %c7_i32_43 : i32
    %97 = arith.index_cast %96 : i32 to index
    %c0_44 = arith.constant 0 : index
    %98 = vector.load %arg2[%97, %c0_44] : memref<1x128xf32, #tpu.memory_space<vmem>>, vector<1x128xf32>
    %c127_i32_45 = arith.constant 127 : i32
    %99 = arith.andi %95, %c127_i32_45 : i32
    %100 = vector.broadcast %99 : i32 to vector<1x128xi32>
    %101 = arith.cmpi eq, %0, %100 : vector<1x128xi32>
    %cst_46 = arith.constant 0.000000e+00 : f32
    %102 = vector.broadcast %cst_46 : f32 to vector<1x128xf32>
    %103 = arith.select %101, %98, %102 : vector<1x128xi1>, vector<1x128xf32>
    %104 = arith.addf %92, %103 : vector<1x128xf32>
    %cst_47 = arith.constant dense<0.000000e+00> : vector<1xf32>
    %105 = vector.multi_reduction <add>, %104, %cst_47 [1] : vector<1x128xf32> to vector<1xf32>
    %106 = vector.shape_cast %105 : vector<1xf32> to vector<1x1xf32>
    %107 = arith.index_cast %c1_i32_20 : i32 to index
    %c0_48 = arith.constant 0 : index
    %108 = vector.load %arg4[%107, %c0_48] : memref<8x1xf32, #tpu.memory_space<vmem>>, vector<1x1xf32>
    tpu.vector_store %arg4[%107, %c0_48], %106 {strides = array<i32>} : memref<8x1xf32, #tpu.memory_space<vmem>>, vector<1x1xf32>,
    %c2_i32_49 = arith.constant 2 : i32
    %c4_i32_50 = arith.constant 4 : i32
    %109 = arith.muli %c2_i32_49, %c4_i32_50 : i32
    %cst_51 = arith.constant 0.000000e+00 : f32
    %110 = vector.broadcast %cst_51 : f32 to vector<1x128xf32>
    %c0_i32_52 = arith.constant 0 : i32
    %111 = arith.addi %109, %c0_i32_52 : i32
    %c0_53 = arith.constant 0 : index
    %112 = arith.index_cast %111 : i32 to index
    %113 = memref.load %arg1[%c0_53, %112] : memref<1x32xi32, #tpu.memory_space<smem>>
    %c7_i32_54 = arith.constant 7 : i32
    %114 = arith.shrsi %113, %c7_i32_54 : i32
    %115 = arith.index_cast %114 : i32 to index
    %c0_55 = arith.constant 0 : index
    %116 = vector.load %arg2[%115, %c0_55] : memref<1x128xf32, #tpu.memory_space<vmem>>, vector<1x128xf32>
    %c127_i32_56 = arith.constant 127 : i32
    %117 = arith.andi %113, %c127_i32_56 : i32
    %118 = vector.broadcast %117 : i32 to vector<1x128xi32>
    %119 = arith.cmpi eq, %0, %118 : vector<1x128xi32>
    %cst_57 = arith.constant 0.000000e+00 : f32
    %120 = vector.broadcast %cst_57 : f32 to vector<1x128xf32>
    %121 = arith.select %119, %116, %120 : vector<1x128xi1>, vector<1x128xf32>
    %122 = arith.addf %110, %121 : vector<1x128xf32>
    %c1_i32_58 = arith.constant 1 : i32
    %123 = arith.addi %109, %c1_i32_58 : i32
    %c0_59 = arith.constant 0 : index
    %124 = arith.index_cast %123 : i32 to index
    %125 = memref.load %arg1[%c0_59, %124] : memref<1x32xi32, #tpu.memory_space<smem>>
    %c7_i32_60 = arith.constant 7 : i32
    %126 = arith.shrsi %125, %c7_i32_60 : i32
    %127 = arith.index_cast %126 : i32 to index
    %c0_61 = arith.constant 0 : index
    %128 = vector.load %arg2[%127, %c0_61] : memref<1x128xf32, #tpu.memory_space<vmem>>, vector<1x128xf32>
    %c127_i32_62 = arith.constant 127 : i32
    %129 = arith.andi %125, %c127_i32_62 : i32
    %130 = vector.broadcast %129 : i32 to vector<1x128xi32>
    %131 = arith.cmpi eq, %0, %130 : vector<1x128xi32>
    %cst_63 = arith.constant 0.000000e+00 : f32
    %132 = vector.broadcast %cst_63 : f32 to vector<1x128xf32>
    %133 = arith.select %131, %128, %132 : vector<1x128xi1>, vector<1x128xf32>
    %134 = arith.addf %122, %133 : vector<1x128xf32>
    %c2_i32_64 = arith.constant 2 : i32
    %135 = arith.addi %109, %c2_i32_64 : i32
    %c0_65 = arith.constant 0 : index
    %136 = arith.index_cast %135 : i32 to index
    %137 = memref.load %arg1[%c0_65, %136] : memref<1x32xi32, #tpu.memory_space<smem>>
    %c7_i32_66 = arith.constant 7 : i32
    %138 = arith.shrsi %137, %c7_i32_66 : i32
    %139 = arith.index_cast %138 : i32 to index
    %c0_67 = arith.constant 0 : index
    %140 = vector.load %arg2[%139, %c0_67] : memref<1x128xf32, #tpu.memory_space<vmem>>, vector<1x128xf32>
    %c127_i32_68 = arith.constant 127 : i32
    %141 = arith.andi %137, %c127_i32_68 : i32
    %142 = vector.broadcast %141 : i32 to vector<1x128xi32>
    %143 = arith.cmpi eq, %0, %142 : vector<1x128xi32>
    %cst_69 = arith.constant 0.000000e+00 : f32
    %144 = vector.broadcast %cst_69 : f32 to vector<1x128xf32>
    %145 = arith.select %143, %140, %144 : vector<1x128xi1>, vector<1x128xf32>
    %146 = arith.addf %134, %145 : vector<1x128xf32>
    %c3_i32_70 = arith.constant 3 : i32
    %147 = arith.addi %109, %c3_i32_70 : i32
    %c0_71 = arith.constant 0 : index
    %148 = arith.index_cast %147 : i32 to index
    %149 = memref.load %arg1[%c0_71, %148] : memref<1x32xi32, #tpu.memory_space<smem>>
    %c7_i32_72 = arith.constant 7 : i32
    %150 = arith.shrsi %149, %c7_i32_72 : i32
    %151 = arith.index_cast %150 : i32 to index
    %c0_73 = arith.constant 0 : index
    %152 = vector.load %arg2[%151, %c0_73] : memref<1x128xf32, #tpu.memory_space<vmem>>, vector<1x128xf32>
    %c127_i32_74 = arith.constant 127 : i32
    %153 = arith.andi %149, %c127_i32_74 : i32
    %154 = vector.broadcast %153 : i32 to vector<1x128xi32>
    %155 = arith.cmpi eq, %0, %154 : vector<1x128xi32>
    %cst_75 = arith.constant 0.000000e+00 : f32
    %156 = vector.broadcast %cst_75 : f32 to vector<1x128xf32>
    %157 = arith.select %155, %152, %156 : vector<1x128xi1>, vector<1x128xf32>
    %158 = arith.addf %146, %157 : vector<1x128xf32>
    %cst_76 = arith.constant dense<0.000000e+00> : vector<1xf32>
    %159 = vector.multi_reduction <add>, %158, %cst_76 [1] : vector<1x128xf32> to vector<1xf32>
    %160 = vector.shape_cast %159 : vector<1xf32> to vector<1x1xf32>
    %161 = arith.index_cast %c2_i32_49 : i32 to index
    %c0_77 = arith.constant 0 : index
    %162 = vector.load %arg4[%161, %c0_77] : memref<8x1xf32, #tpu.memory_space<vmem>>, vector<1x1xf32>
    tpu.vector_store %arg4[%161, %c0_77], %160 {strides = array<i32>} : memref<8x1xf32, #tpu.memory_space<vmem>>, vector<1x1xf32>,
    %c3_i32_78 = arith.constant 3 : i32
    %c4_i32_79 = arith.constant 4 : i32
    %163 = arith.muli %c3_i32_78, %c4_i32_79 : i32
    %cst_80 = arith.constant 0.000000e+00 : f32
    %164 = vector.broadcast %cst_80 : f32 to vector<1x128xf32>
    %c0_i32_81 = arith.constant 0 : i32
    %165 = arith.addi %163, %c0_i32_81 : i32
    %c0_82 = arith.constant 0 : index
    %166 = arith.index_cast %165 : i32 to index
    %167 = memref.load %arg1[%c0_82, %166] : memref<1x32xi32, #tpu.memory_space<smem>>
    %c7_i32_83 = arith.constant 7 : i32
    %168 = arith.shrsi %167, %c7_i32_83 : i32
    %169 = arith.index_cast %168 : i32 to index
    %c0_84 = arith.constant 0 : index
    %170 = vector.load %arg2[%169, %c0_84] : memref<1x128xf32, #tpu.memory_space<vmem>>, vector<1x128xf32>
    %c127_i32_85 = arith.constant 127 : i32
    %171 = arith.andi %167, %c127_i32_85 : i32
    %172 = vector.broadcast %171 : i32 to vector<1x128xi32>
    %173 = arith.cmpi eq, %0, %172 : vector<1x128xi32>
    %cst_86 = arith.constant 0.000000e+00 : f32
    %174 = vector.broadcast %cst_86 : f32 to vector<1x128xf32>
    %175 = arith.select %173, %170, %174 : vector<1x128xi1>, vector<1x128xf32>
    %176 = arith.addf %164, %175 : vector<1x128xf32>
    %c1_i32_87 = arith.constant 1 : i32
    %177 = arith.addi %163, %c1_i32_87 : i32
    %c0_88 = arith.constant 0 : index
    %178 = arith.index_cast %177 : i32 to index
    %179 = memref.load %arg1[%c0_88, %178] : memref<1x32xi32, #tpu.memory_space<smem>>
    %c7_i32_89 = arith.constant 7 : i32
    %180 = arith.shrsi %179, %c7_i32_89 : i32
    %181 = arith.index_cast %180 : i32 to index
    %c0_90 = arith.constant 0 : index
    %182 = vector.load %arg2[%181, %c0_90] : memref<1x128xf32, #tpu.memory_space<vmem>>, vector<1x128xf32>
    %c127_i32_91 = arith.constant 127 : i32
    %183 = arith.andi %179, %c127_i32_91 : i32
    %184 = vector.broadcast %183 : i32 to vector<1x128xi32>
    %185 = arith.cmpi eq, %0, %184 : vector<1x128xi32>
    %cst_92 = arith.constant 0.000000e+00 : f32
    %186 = vector.broadcast %cst_92 : f32 to vector<1x128xf32>
    %187 = arith.select %185, %182, %186 : vector<1x128xi1>, vector<1x128xf32>
    %188 = arith.addf %176, %187 : vector<1x128xf32>
    %c2_i32_93 = arith.constant 2 : i32
    %189 = arith.addi %163, %c2_i32_93 : i32
    %c0_94 = arith.constant 0 : index
    %190 = arith.index_cast %189 : i32 to index
    %191 = memref.load %arg1[%c0_94, %190] : memref<1x32xi32, #tpu.memory_space<smem>>
    %c7_i32_95 = arith.constant 7 : i32
    %192 = arith.shrsi %191, %c7_i32_95 : i32
    %193 = arith.index_cast %192 : i32 to index
    %c0_96 = arith.constant 0 : index
    %194 = vector.load %arg2[%193, %c0_96] : memref<1x128xf32, #tpu.memory_space<vmem>>, vector<1x128xf32>
    %c127_i32_97 = arith.constant 127 : i32
    %195 = arith.andi %191, %c127_i32_97 : i32
    %196 = vector.broadcast %195 : i32 to vector<1x128xi32>
    %197 = arith.cmpi eq, %0, %196 : vector<1x128xi32>
    %cst_98 = arith.constant 0.000000e+00 : f32
    %198 = vector.broadcast %cst_98 : f32 to vector<1x128xf32>
    %199 = arith.select %197, %194, %198 : vector<1x128xi1>, vector<1x128xf32>
    %200 = arith.addf %188, %199 : vector<1x128xf32>
    %c3_i32_99 = arith.constant 3 : i32
    %201 = arith.addi %163, %c3_i32_99 : i32
    %c0_100 = arith.constant 0 : index
    %202 = arith.index_cast %201 : i32 to index
    %203 = memref.load %arg1[%c0_100, %202] : memref<1x32xi32, #tpu.memory_space<smem>>
    %c7_i32_101 = arith.constant 7 : i32
    %204 = arith.shrsi %203, %c7_i32_101 : i32
    %205 = arith.index_cast %204 : i32 to index
    %c0_102 = arith.constant 0 : index
    %206 = vector.load %arg2[%205, %c0_102] : memref<1x128xf32, #tpu.memory_space<vmem>>, vector<1x128xf32>
    %c127_i32_103 = arith.constant 127 : i32
    %207 = arith.andi %203, %c127_i32_103 : i32
    %208 = vector.broadcast %207 : i32 to vector<1x128xi32>
    %209 = arith.cmpi eq, %0, %208 : vector<1x128xi32>
    %cst_104 = arith.constant 0.000000e+00 : f32
    %210 = vector.broadcast %cst_104 : f32 to vector<1x128xf32>
    %211 = arith.select %209, %206, %210 : vector<1x128xi1>, vector<1x128xf32>
    %212 = arith.addf %200, %211 : vector<1x128xf32>
    %cst_105 = arith.constant dense<0.000000e+00> : vector<1xf32>
    %213 = vector.multi_reduction <add>, %212, %cst_105 [1] : vector<1x128xf32> to vector<1xf32>
    %214 = vector.shape_cast %213 : vector<1xf32> to vector<1x1xf32>
    %215 = arith.index_cast %c3_i32_78 : i32 to index
    %c0_106 = arith.constant 0 : index
    %216 = vector.load %arg4[%215, %c0_106] : memref<8x1xf32, #tpu.memory_space<vmem>>, vector<1x1xf32>
    tpu.vector_store %arg4[%215, %c0_106], %214 {strides = array<i32>} : memref<8x1xf32, #tpu.memory_space<vmem>>, vector<1x1xf32>,
    %c4_i32_107 = arith.constant 4 : i32
    %c4_i32_108 = arith.constant 4 : i32
    %217 = arith.muli %c4_i32_107, %c4_i32_108 : i32
    %cst_109 = arith.constant 0.000000e+00 : f32
    %218 = vector.broadcast %cst_109 : f32 to vector<1x128xf32>
    %c0_i32_110 = arith.constant 0 : i32
    %219 = arith.addi %217, %c0_i32_110 : i32
    %c0_111 = arith.constant 0 : index
    %220 = arith.index_cast %219 : i32 to index
    %221 = memref.load %arg1[%c0_111, %220] : memref<1x32xi32, #tpu.memory_space<smem>>
    %c7_i32_112 = arith.constant 7 : i32
    %222 = arith.shrsi %221, %c7_i32_112 : i32
    %223 = arith.index_cast %222 : i32 to index
    %c0_113 = arith.constant 0 : index
    %224 = vector.load %arg2[%223, %c0_113] : memref<1x128xf32, #tpu.memory_space<vmem>>, vector<1x128xf32>
    %c127_i32_114 = arith.constant 127 : i32
    %225 = arith.andi %221, %c127_i32_114 : i32
    %226 = vector.broadcast %225 : i32 to vector<1x128xi32>
    %227 = arith.cmpi eq, %0, %226 : vector<1x128xi32>
    %cst_115 = arith.constant 0.000000e+00 : f32
    %228 = vector.broadcast %cst_115 : f32 to vector<1x128xf32>
    %229 = arith.select %227, %224, %228 : vector<1x128xi1>, vector<1x128xf32>
    %230 = arith.addf %218, %229 : vector<1x128xf32>
    %c1_i32_116 = arith.constant 1 : i32
    %231 = arith.addi %217, %c1_i32_116 : i32
    %c0_117 = arith.constant 0 : index
    %232 = arith.index_cast %231 : i32 to index
    %233 = memref.load %arg1[%c0_117, %232] : memref<1x32xi32, #tpu.memory_space<smem>>
    %c7_i32_118 = arith.constant 7 : i32
    %234 = arith.shrsi %233, %c7_i32_118 : i32
    %235 = arith.index_cast %234 : i32 to index
    %c0_119 = arith.constant 0 : index
    %236 = vector.load %arg2[%235, %c0_119] : memref<1x128xf32, #tpu.memory_space<vmem>>, vector<1x128xf32>
    %c127_i32_120 = arith.constant 127 : i32
    %237 = arith.andi %233, %c127_i32_120 : i32
    %238 = vector.broadcast %237 : i32 to vector<1x128xi32>
    %239 = arith.cmpi eq, %0, %238 : vector<1x128xi32>
    %cst_121 = arith.constant 0.000000e+00 : f32
    %240 = vector.broadcast %cst_121 : f32 to vector<1x128xf32>
    %241 = arith.select %239, %236, %240 : vector<1x128xi1>, vector<1x128xf32>
    %242 = arith.addf %230, %241 : vector<1x128xf32>
    %c2_i32_122 = arith.constant 2 : i32
    %243 = arith.addi %217, %c2_i32_122 : i32
    %c0_123 = arith.constant 0 : index
    %244 = arith.index_cast %243 : i32 to index
    %245 = memref.load %arg1[%c0_123, %244] : memref<1x32xi32, #tpu.memory_space<smem>>
    %c7_i32_124 = arith.constant 7 : i32
    %246 = arith.shrsi %245, %c7_i32_124 : i32
    %247 = arith.index_cast %246 : i32 to index
    %c0_125 = arith.constant 0 : index
    %248 = vector.load %arg2[%247, %c0_125] : memref<1x128xf32, #tpu.memory_space<vmem>>, vector<1x128xf32>
    %c127_i32_126 = arith.constant 127 : i32
    %249 = arith.andi %245, %c127_i32_126 : i32
    %250 = vector.broadcast %249 : i32 to vector<1x128xi32>
    %251 = arith.cmpi eq, %0, %250 : vector<1x128xi32>
    %cst_127 = arith.constant 0.000000e+00 : f32
    %252 = vector.broadcast %cst_127 : f32 to vector<1x128xf32>
    %253 = arith.select %251, %248, %252 : vector<1x128xi1>, vector<1x128xf32>
    %254 = arith.addf %242, %253 : vector<1x128xf32>
    %c3_i32_128 = arith.constant 3 : i32
    %255 = arith.addi %217, %c3_i32_128 : i32
    %c0_129 = arith.constant 0 : index
    %256 = arith.index_cast %255 : i32 to index
    %257 = memref.load %arg1[%c0_129, %256] : memref<1x32xi32, #tpu.memory_space<smem>>
    %c7_i32_130 = arith.constant 7 : i32
    %258 = arith.shrsi %257, %c7_i32_130 : i32
    %259 = arith.index_cast %258 : i32 to index
    %c0_131 = arith.constant 0 : index
    %260 = vector.load %arg2[%259, %c0_131] : memref<1x128xf32, #tpu.memory_space<vmem>>, vector<1x128xf32>
    %c127_i32_132 = arith.constant 127 : i32
    %261 = arith.andi %257, %c127_i32_132 : i32
    %262 = vector.broadcast %261 : i32 to vector<1x128xi32>
    %263 = arith.cmpi eq, %0, %262 : vector<1x128xi32>
    %cst_133 = arith.constant 0.000000e+00 : f32
    %264 = vector.broadcast %cst_133 : f32 to vector<1x128xf32>
    %265 = arith.select %263, %260, %264 : vector<1x128xi1>, vector<1x128xf32>
    %266 = arith.addf %254, %265 : vector<1x128xf32>
    %cst_134 = arith.constant dense<0.000000e+00> : vector<1xf32>
    %267 = vector.multi_reduction <add>, %266, %cst_134 [1] : vector<1x128xf32> to vector<1xf32>
    %268 = vector.shape_cast %267 : vector<1xf32> to vector<1x1xf32>
    %269 = arith.index_cast %c4_i32_107 : i32 to index
    %c0_135 = arith.constant 0 : index
    %270 = vector.load %arg4[%269, %c0_135] : memref<8x1xf32, #tpu.memory_space<vmem>>, vector<1x1xf32>
    tpu.vector_store %arg4[%269, %c0_135], %268 {strides = array<i32>} : memref<8x1xf32, #tpu.memory_space<vmem>>, vector<1x1xf32>,
    %c5_i32 = arith.constant 5 : i32
    %c4_i32_136 = arith.constant 4 : i32
    %271 = arith.muli %c5_i32, %c4_i32_136 : i32
    %cst_137 = arith.constant 0.000000e+00 : f32
    %272 = vector.broadcast %cst_137 : f32 to vector<1x128xf32>
    %c0_i32_138 = arith.constant 0 : i32
    %273 = arith.addi %271, %c0_i32_138 : i32
    %c0_139 = arith.constant 0 : index
    %274 = arith.index_cast %273 : i32 to index
    %275 = memref.load %arg1[%c0_139, %274] : memref<1x32xi32, #tpu.memory_space<smem>>
    %c7_i32_140 = arith.constant 7 : i32
    %276 = arith.shrsi %275, %c7_i32_140 : i32
    %277 = arith.index_cast %276 : i32 to index
    %c0_141 = arith.constant 0 : index
    %278 = vector.load %arg2[%277, %c0_141] : memref<1x128xf32, #tpu.memory_space<vmem>>, vector<1x128xf32>
    %c127_i32_142 = arith.constant 127 : i32
    %279 = arith.andi %275, %c127_i32_142 : i32
    %280 = vector.broadcast %279 : i32 to vector<1x128xi32>
    %281 = arith.cmpi eq, %0, %280 : vector<1x128xi32>
    %cst_143 = arith.constant 0.000000e+00 : f32
    %282 = vector.broadcast %cst_143 : f32 to vector<1x128xf32>
    %283 = arith.select %281, %278, %282 : vector<1x128xi1>, vector<1x128xf32>
    %284 = arith.addf %272, %283 : vector<1x128xf32>
    %c1_i32_144 = arith.constant 1 : i32
    %285 = arith.addi %271, %c1_i32_144 : i32
    %c0_145 = arith.constant 0 : index
    %286 = arith.index_cast %285 : i32 to index
    %287 = memref.load %arg1[%c0_145, %286] : memref<1x32xi32, #tpu.memory_space<smem>>
    %c7_i32_146 = arith.constant 7 : i32
    %288 = arith.shrsi %287, %c7_i32_146 : i32
    %289 = arith.index_cast %288 : i32 to index
    %c0_147 = arith.constant 0 : index
    %290 = vector.load %arg2[%289, %c0_147] : memref<1x128xf32, #tpu.memory_space<vmem>>, vector<1x128xf32>
    %c127_i32_148 = arith.constant 127 : i32
    %291 = arith.andi %287, %c127_i32_148 : i32
    %292 = vector.broadcast %291 : i32 to vector<1x128xi32>
    %293 = arith.cmpi eq, %0, %292 : vector<1x128xi32>
    %cst_149 = arith.constant 0.000000e+00 : f32
    %294 = vector.broadcast %cst_149 : f32 to vector<1x128xf32>
    %295 = arith.select %293, %290, %294 : vector<1x128xi1>, vector<1x128xf32>
    %296 = arith.addf %284, %295 : vector<1x128xf32>
    %c2_i32_150 = arith.constant 2 : i32
    %297 = arith.addi %271, %c2_i32_150 : i32
    %c0_151 = arith.constant 0 : index
    %298 = arith.index_cast %297 : i32 to index
    %299 = memref.load %arg1[%c0_151, %298] : memref<1x32xi32, #tpu.memory_space<smem>>
    %c7_i32_152 = arith.constant 7 : i32
    %300 = arith.shrsi %299, %c7_i32_152 : i32
    %301 = arith.index_cast %300 : i32 to index
    %c0_153 = arith.constant 0 : index
    %302 = vector.load %arg2[%301, %c0_153] : memref<1x128xf32, #tpu.memory_space<vmem>>, vector<1x128xf32>
    %c127_i32_154 = arith.constant 127 : i32
    %303 = arith.andi %299, %c127_i32_154 : i32
    %304 = vector.broadcast %303 : i32 to vector<1x128xi32>
    %305 = arith.cmpi eq, %0, %304 : vector<1x128xi32>
    %cst_155 = arith.constant 0.000000e+00 : f32
    %306 = vector.broadcast %cst_155 : f32 to vector<1x128xf32>
    %307 = arith.select %305, %302, %306 : vector<1x128xi1>, vector<1x128xf32>
    %308 = arith.addf %296, %307 : vector<1x128xf32>
    %c3_i32_156 = arith.constant 3 : i32
    %309 = arith.addi %271, %c3_i32_156 : i32
    %c0_157 = arith.constant 0 : index
    %310 = arith.index_cast %309 : i32 to index
    %311 = memref.load %arg1[%c0_157, %310] : memref<1x32xi32, #tpu.memory_space<smem>>
    %c7_i32_158 = arith.constant 7 : i32
    %312 = arith.shrsi %311, %c7_i32_158 : i32
    %313 = arith.index_cast %312 : i32 to index
    %c0_159 = arith.constant 0 : index
    %314 = vector.load %arg2[%313, %c0_159] : memref<1x128xf32, #tpu.memory_space<vmem>>, vector<1x128xf32>
    %c127_i32_160 = arith.constant 127 : i32
    %315 = arith.andi %311, %c127_i32_160 : i32
    %316 = vector.broadcast %315 : i32 to vector<1x128xi32>
    %317 = arith.cmpi eq, %0, %316 : vector<1x128xi32>
    %cst_161 = arith.constant 0.000000e+00 : f32
    %318 = vector.broadcast %cst_161 : f32 to vector<1x128xf32>
    %319 = arith.select %317, %314, %318 : vector<1x128xi1>, vector<1x128xf32>
    %320 = arith.addf %308, %319 : vector<1x128xf32>
    %cst_162 = arith.constant dense<0.000000e+00> : vector<1xf32>
    %321 = vector.multi_reduction <add>, %320, %cst_162 [1] : vector<1x128xf32> to vector<1xf32>
    %322 = vector.shape_cast %321 : vector<1xf32> to vector<1x1xf32>
    %323 = arith.index_cast %c5_i32 : i32 to index
    %c0_163 = arith.constant 0 : index
    %324 = vector.load %arg4[%323, %c0_163] : memref<8x1xf32, #tpu.memory_space<vmem>>, vector<1x1xf32>
    tpu.vector_store %arg4[%323, %c0_163], %322 {strides = array<i32>} : memref<8x1xf32, #tpu.memory_space<vmem>>, vector<1x1xf32>,
    %c6_i32 = arith.constant 6 : i32
    %c4_i32_164 = arith.constant 4 : i32
    %325 = arith.muli %c6_i32, %c4_i32_164 : i32
    %cst_165 = arith.constant 0.000000e+00 : f32
    %326 = vector.broadcast %cst_165 : f32 to vector<1x128xf32>
    %c0_i32_166 = arith.constant 0 : i32
    %327 = arith.addi %325, %c0_i32_166 : i32
    %c0_167 = arith.constant 0 : index
    %328 = arith.index_cast %327 : i32 to index
    %329 = memref.load %arg1[%c0_167, %328] : memref<1x32xi32, #tpu.memory_space<smem>>
    %c7_i32_168 = arith.constant 7 : i32
    %330 = arith.shrsi %329, %c7_i32_168 : i32
    %331 = arith.index_cast %330 : i32 to index
    %c0_169 = arith.constant 0 : index
    %332 = vector.load %arg2[%331, %c0_169] : memref<1x128xf32, #tpu.memory_space<vmem>>, vector<1x128xf32>
    %c127_i32_170 = arith.constant 127 : i32
    %333 = arith.andi %329, %c127_i32_170 : i32
    %334 = vector.broadcast %333 : i32 to vector<1x128xi32>
    %335 = arith.cmpi eq, %0, %334 : vector<1x128xi32>
    %cst_171 = arith.constant 0.000000e+00 : f32
    %336 = vector.broadcast %cst_171 : f32 to vector<1x128xf32>
    %337 = arith.select %335, %332, %336 : vector<1x128xi1>, vector<1x128xf32>
    %338 = arith.addf %326, %337 : vector<1x128xf32>
    %c1_i32_172 = arith.constant 1 : i32
    %339 = arith.addi %325, %c1_i32_172 : i32
    %c0_173 = arith.constant 0 : index
    %340 = arith.index_cast %339 : i32 to index
    %341 = memref.load %arg1[%c0_173, %340] : memref<1x32xi32, #tpu.memory_space<smem>>
    %c7_i32_174 = arith.constant 7 : i32
    %342 = arith.shrsi %341, %c7_i32_174 : i32
    %343 = arith.index_cast %342 : i32 to index
    %c0_175 = arith.constant 0 : index
    %344 = vector.load %arg2[%343, %c0_175] : memref<1x128xf32, #tpu.memory_space<vmem>>, vector<1x128xf32>
    %c127_i32_176 = arith.constant 127 : i32
    %345 = arith.andi %341, %c127_i32_176 : i32
    %346 = vector.broadcast %345 : i32 to vector<1x128xi32>
    %347 = arith.cmpi eq, %0, %346 : vector<1x128xi32>
    %cst_177 = arith.constant 0.000000e+00 : f32
    %348 = vector.broadcast %cst_177 : f32 to vector<1x128xf32>
    %349 = arith.select %347, %344, %348 : vector<1x128xi1>, vector<1x128xf32>
    %350 = arith.addf %338, %349 : vector<1x128xf32>
    %c2_i32_178 = arith.constant 2 : i32
    %351 = arith.addi %325, %c2_i32_178 : i32
    %c0_179 = arith.constant 0 : index
    %352 = arith.index_cast %351 : i32 to index
    %353 = memref.load %arg1[%c0_179, %352] : memref<1x32xi32, #tpu.memory_space<smem>>
    %c7_i32_180 = arith.constant 7 : i32
    %354 = arith.shrsi %353, %c7_i32_180 : i32
    %355 = arith.index_cast %354 : i32 to index
    %c0_181 = arith.constant 0 : index
    %356 = vector.load %arg2[%355, %c0_181] : memref<1x128xf32, #tpu.memory_space<vmem>>, vector<1x128xf32>
    %c127_i32_182 = arith.constant 127 : i32
    %357 = arith.andi %353, %c127_i32_182 : i32
    %358 = vector.broadcast %357 : i32 to vector<1x128xi32>
    %359 = arith.cmpi eq, %0, %358 : vector<1x128xi32>
    %cst_183 = arith.constant 0.000000e+00 : f32
    %360 = vector.broadcast %cst_183 : f32 to vector<1x128xf32>
    %361 = arith.select %359, %356, %360 : vector<1x128xi1>, vector<1x128xf32>
    %362 = arith.addf %350, %361 : vector<1x128xf32>
    %c3_i32_184 = arith.constant 3 : i32
    %363 = arith.addi %325, %c3_i32_184 : i32
    %c0_185 = arith.constant 0 : index
    %364 = arith.index_cast %363 : i32 to index
    %365 = memref.load %arg1[%c0_185, %364] : memref<1x32xi32, #tpu.memory_space<smem>>
    %c7_i32_186 = arith.constant 7 : i32
    %366 = arith.shrsi %365, %c7_i32_186 : i32
    %367 = arith.index_cast %366 : i32 to index
    %c0_187 = arith.constant 0 : index
    %368 = vector.load %arg2[%367, %c0_187] : memref<1x128xf32, #tpu.memory_space<vmem>>, vector<1x128xf32>
    %c127_i32_188 = arith.constant 127 : i32
    %369 = arith.andi %365, %c127_i32_188 : i32
    %370 = vector.broadcast %369 : i32 to vector<1x128xi32>
    %371 = arith.cmpi eq, %0, %370 : vector<1x128xi32>
    %cst_189 = arith.constant 0.000000e+00 : f32
    %372 = vector.broadcast %cst_189 : f32 to vector<1x128xf32>
    %373 = arith.select %371, %368, %372 : vector<1x128xi1>, vector<1x128xf32>
    %374 = arith.addf %362, %373 : vector<1x128xf32>
    %cst_190 = arith.constant dense<0.000000e+00> : vector<1xf32>
    %375 = vector.multi_reduction <add>, %374, %cst_190 [1] : vector<1x128xf32> to vector<1xf32>
    %376 = vector.shape_cast %375 : vector<1xf32> to vector<1x1xf32>
    %377 = arith.index_cast %c6_i32 : i32 to index
    %c0_191 = arith.constant 0 : index
    %378 = vector.load %arg4[%377, %c0_191] : memref<8x1xf32, #tpu.memory_space<vmem>>, vector<1x1xf32>
    tpu.vector_store %arg4[%377, %c0_191], %376 {strides = array<i32>} : memref<8x1xf32, #tpu.memory_space<vmem>>, vector<1x1xf32>,
    %c7_i32_192 = arith.constant 7 : i32
    %c4_i32_193 = arith.constant 4 : i32
    %379 = arith.muli %c7_i32_192, %c4_i32_193 : i32
    %cst_194 = arith.constant 0.000000e+00 : f32
    %380 = vector.broadcast %cst_194 : f32 to vector<1x128xf32>
    %c0_i32_195 = arith.constant 0 : i32
    %381 = arith.addi %379, %c0_i32_195 : i32
    %c0_196 = arith.constant 0 : index
    %382 = arith.index_cast %381 : i32 to index
    %383 = memref.load %arg1[%c0_196, %382] : memref<1x32xi32, #tpu.memory_space<smem>>
    %c7_i32_197 = arith.constant 7 : i32
    %384 = arith.shrsi %383, %c7_i32_197 : i32
    %385 = arith.index_cast %384 : i32 to index
    %c0_198 = arith.constant 0 : index
    %386 = vector.load %arg2[%385, %c0_198] : memref<1x128xf32, #tpu.memory_space<vmem>>, vector<1x128xf32>
    %c127_i32_199 = arith.constant 127 : i32
    %387 = arith.andi %383, %c127_i32_199 : i32
    %388 = vector.broadcast %387 : i32 to vector<1x128xi32>
    %389 = arith.cmpi eq, %0, %388 : vector<1x128xi32>
    %cst_200 = arith.constant 0.000000e+00 : f32
    %390 = vector.broadcast %cst_200 : f32 to vector<1x128xf32>
    %391 = arith.select %389, %386, %390 : vector<1x128xi1>, vector<1x128xf32>
    %392 = arith.addf %380, %391 : vector<1x128xf32>
    %c1_i32_201 = arith.constant 1 : i32
    %393 = arith.addi %379, %c1_i32_201 : i32
    %c0_202 = arith.constant 0 : index
    %394 = arith.index_cast %393 : i32 to index
    %395 = memref.load %arg1[%c0_202, %394] : memref<1x32xi32, #tpu.memory_space<smem>>
    %c7_i32_203 = arith.constant 7 : i32
    %396 = arith.shrsi %395, %c7_i32_203 : i32
    %397 = arith.index_cast %396 : i32 to index
    %c0_204 = arith.constant 0 : index
    %398 = vector.load %arg2[%397, %c0_204] : memref<1x128xf32, #tpu.memory_space<vmem>>, vector<1x128xf32>
    %c127_i32_205 = arith.constant 127 : i32
    %399 = arith.andi %395, %c127_i32_205 : i32
    %400 = vector.broadcast %399 : i32 to vector<1x128xi32>
    %401 = arith.cmpi eq, %0, %400 : vector<1x128xi32>
    %cst_206 = arith.constant 0.000000e+00 : f32
    %402 = vector.broadcast %cst_206 : f32 to vector<1x128xf32>
    %403 = arith.select %401, %398, %402 : vector<1x128xi1>, vector<1x128xf32>
    %404 = arith.addf %392, %403 : vector<1x128xf32>
    %c2_i32_207 = arith.constant 2 : i32
    %405 = arith.addi %379, %c2_i32_207 : i32
    %c0_208 = arith.constant 0 : index
    %406 = arith.index_cast %405 : i32 to index
    %407 = memref.load %arg1[%c0_208, %406] : memref<1x32xi32, #tpu.memory_space<smem>>
    %c7_i32_209 = arith.constant 7 : i32
    %408 = arith.shrsi %407, %c7_i32_209 : i32
    %409 = arith.index_cast %408 : i32 to index
    %c0_210 = arith.constant 0 : index
    %410 = vector.load %arg2[%409, %c0_210] : memref<1x128xf32, #tpu.memory_space<vmem>>, vector<1x128xf32>
    %c127_i32_211 = arith.constant 127 : i32
    %411 = arith.andi %407, %c127_i32_211 : i32
    %412 = vector.broadcast %411 : i32 to vector<1x128xi32>
    %413 = arith.cmpi eq, %0, %412 : vector<1x128xi32>
    %cst_212 = arith.constant 0.000000e+00 : f32
    %414 = vector.broadcast %cst_212 : f32 to vector<1x128xf32>
    %415 = arith.select %413, %410, %414 : vector<1x128xi1>, vector<1x128xf32>
    %416 = arith.addf %404, %415 : vector<1x128xf32>
    %c3_i32_213 = arith.constant 3 : i32
    %417 = arith.addi %379, %c3_i32_213 : i32
    %c0_214 = arith.constant 0 : index
    %418 = arith.index_cast %417 : i32 to index
    %419 = memref.load %arg1[%c0_214, %418] : memref<1x32xi32, #tpu.memory_space<smem>>
    %c7_i32_215 = arith.constant 7 : i32
    %420 = arith.shrsi %419, %c7_i32_215 : i32
    %421 = arith.index_cast %420 : i32 to index
    %c0_216 = arith.constant 0 : index
    %422 = vector.load %arg2[%421, %c0_216] : memref<1x128xf32, #tpu.memory_space<vmem>>, vector<1x128xf32>
    %c127_i32_217 = arith.constant 127 : i32
    %423 = arith.andi %419, %c127_i32_217 : i32
    %424 = vector.broadcast %423 : i32 to vector<1x128xi32>
    %425 = arith.cmpi eq, %0, %424 : vector<1x128xi32>
    %cst_218 = arith.constant 0.000000e+00 : f32
    %426 = vector.broadcast %cst_218 : f32 to vector<1x128xf32>
    %427 = arith.select %425, %422, %426 : vector<1x128xi1>, vector<1x128xf32>
    %428 = arith.addf %416, %427 : vector<1x128xf32>
    %cst_219 = arith.constant dense<0.000000e+00> : vector<1xf32>
    %429 = vector.multi_reduction <add>, %428, %cst_219 [1] : vector<1x128xf32> to vector<1xf32>
    %430 = vector.shape_cast %429 : vector<1xf32> to vector<1x1xf32>
    %431 = arith.index_cast %c7_i32_192 : i32 to index
    %c0_220 = arith.constant 0 : index
    %432 = vector.load %arg4[%431, %c0_220] : memref<8x1xf32, #tpu.memory_space<vmem>>, vector<1x1xf32>
    tpu.vector_store %arg4[%431, %c0_220], %430 {strides = array<i32>} : memref<8x1xf32, #tpu.memory_space<vmem>>, vector<1x1xf32>,
    %c8_i32 = arith.constant 8 : i32
    %c0_221 = arith.constant 0 : index
    %c0_222 = arith.constant 0 : index
    %433 = vector.load %arg4[%c0_221, %c0_222] : memref<8x1xf32, #tpu.memory_space<vmem>>, vector<8x1xf32>
    %c0_223 = arith.constant 0 : index
    %c0_224 = arith.constant 0 : index
    %434 = vector.load %arg3[%c0_223, %c0_224] : memref<1x1xf32, #tpu.memory_space<vmem>>, vector<1x1xf32>
    %435 = vector.broadcast %434 : vector<1x1xf32> to vector<8x1xf32>
    %436 = arith.addf %433, %435 : vector<8x1xf32>
    %c0_225 = arith.constant 0 : index
    %c0_226 = arith.constant 0 : index
    %437 = vector.load %arg4[%c0_225, %c0_226] : memref<8x1xf32, #tpu.memory_space<vmem>>, vector<8x1xf32>
    tpu.vector_store %arg4[%c0_225, %c0_226], %436 {strides = array<i32>} : memref<8x1xf32, #tpu.memory_space<vmem>>, vector<8x1xf32>,
    return
  }
  func.func @transform_0(%arg0: i32) -> (i32, i32) {
    %c0_i32 = arith.constant 0 : i32
    %c0_i32_0 = arith.constant 0 : i32
    return %arg0, %c0_i32 : i32, i32
  }
  func.func @transform_1(%arg0: i32) -> (i32, i32) {
    %c0_i32 = arith.constant 0 : i32
    %c0_i32_0 = arith.constant 0 : i32
    %c0_i32_1 = arith.constant 0 : i32
    return %c0_i32, %c0_i32_0 : i32, i32
  }
  func.func @transform_2(%arg0: i32) -> (i32, i32) {
    %c0_i32 = arith.constant 0 : i32
    %c0_i32_0 = arith.constant 0 : i32
    %c0_i32_1 = arith.constant 0 : i32
    return %c0_i32, %c0_i32_0 : i32, i32
  }
  func.func @transform_3(%arg0: i32) -> (i32, i32) {
    %c0_i32 = arith.constant 0 : i32
    %c0_i32_0 = arith.constant 0 : i32
    return %arg0, %c0_i32 : i32, i32
  }
}

</mosaic_0001>

<bundles_post_ra>
// kernel: tpu_custom_call.1
= control target key start
LH: loop header
LB: loop body
LE: loop exit
PB: predicated region body
PF: predicated region fallthrough
CT: control target
= control target key end

     0   :  { %s747_s0 = inlined_call_operand.vmem [shape: s32[1,32], index: 0, kind: input, shape index: {}]   ;;  %s748_s1 = inlined_call_operand.vmem [shape: f32[1,128], index: 1, kind: input, shape index: {}]   ;;  %s749_s2 = inlined_call_operand.<no memory space> [shape: f32[1,1], index: 2, kind: input, shape index: {}]   ;;  %s750_s3 = inlined_call_operand.vmem [shape: f32[8,1], index: 3, kind: output, shape index: {}]  }
   0x1   :  { %v8_v0 = vstv %s749_s2 }
   0x2   :  { %9 = vst [vmem:[#allocation2] sm:$0x1] %v8_v0 }
   0x3   :  { %10 = vsyncpa [#allocation4], 0  ;;  %s17_s16 = sshll.u32 %s747_s0, 4  ;;  %s18_s16 = int_to_ptr.vmem [resolvable:$true] %s17_s16 }
   0x4   :  { %s434_s17 = scalar_lea.vmem %s18_s16, 16  ;;  %p439_p1 = scmp.lt.s32.totalorder %s18_s16, %s18_s16 }
   0x5   :  { %p435_p0 = scmp.ne.s32.totalorder %s18_s16, %s434_s17  ;;  %p440_p2 = scmp.lt.s32.totalorder %s434_s17, %s434_s17 }
   0x7   :  { %p441_p3 = por %p440_p2, %p439_p1 }
   0x9   :  { %p442_p4 = pnand %p441_p3, %p435_p0 }
   0xb   :  { %445 = shalt.err (!%p442_p4)
}
   0xc   :  { %s448_s18 = smov [#allocation3]  }
   0xd   :  { %20 = dma.vmem_to_smem %s18_s16, 16, %s448_s18, [#allocation4]  }
   0xe   :  { %446 = dma.done.wait [#allocation4], 16  }
   0xf   :  { %447 = vsyncadd [#allocation4], 4294967280 }
  0x10   :  { %28 = sfence }
  0x11   :  { %v29_v1 = vlaneseq  ;;  %s408_s2 = sld [smem:[#allocation3 + $0x8]]  ;;  %s409_s19 = sld [smem:[#allocation3 + $0x9]]  ;;  %vm67_vm5 = vcmask 1040384  }
  0x12   :  { %s410_s20 = sld [smem:[#allocation3 + $0xa]]  ;;  %s475_s21 = sld [smem:[#allocation3 + $0xb]] }
  0x13   :  { %s477_s0 = sld [smem:[#allocation3]]  ;;  %s479_s22 = sld [smem:[#allocation3 + $0x1]]  ;;  %v485_v2 = vand.u32 127, %v29_v1 }
  0x14   :  { %s481_s23 = sld [smem:[#allocation3 + $0x2]]  ;;  %s483_s24 = sld [smem:[#allocation3 + $0x3]] }
  0x15   :  { %s487_s25 = sld [smem:[#allocation3 + $0xc]]  ;;  %s489_s26 = sld [smem:[#allocation3 + $0xd]] }
  0x16   :  { %s491_s27 = sld [smem:[#allocation3 + $0xe]]  ;;  %s493_s28 = sld [smem:[#allocation3 + $0xf]] }
  0x17   :  { %s114_s29 = sshra.s32 %s408_s2, 7  ;;  %s117_s30 = sand.u32 127, %s408_s2 }
  0x18   :  { %s115_s6 = scalar_lea.vmem %s748_s1, %s114_s29  ;;  %v118_v3 = vstv %s117_s30  ;;  %s123_s7 = sshra.s32 %s409_s19, 7 }
  0x19   :  { %v116_v4 = vld [vmem:[%s115_s6] sm:$0x1]  ;;  %vm119_vm0 = vcmp.eq.s32.totalorder %v485_v2, %v118_v3  ;;  %s124_s10 = scalar_lea.vmem %s748_s1, %s123_s7  ;;  %s126_s11 = sand.u32 127, %s409_s19 }
  0x1a   :  { %v120_v5 = vsel %vm119_vm0, %v116_v4, 0.0  ;;  %v125_v6 = vld [vmem:[%s124_s10] sm:$0x1]  ;;  %v127_v7 = vstv %s126_s11  ;;  %s132_s12 = sshra.s32 %s410_s20, 7  ;;  %s135_s13 = sand.u32 127, %s410_s20 }
  0x1b   :  { %vm128_vm1 = vcmp.eq.s32.totalorder %v485_v2, %v127_v7  ;;  %s133_s16 = scalar_lea.vmem %s748_s1, %s132_s12  ;;  %v136_v8 = vstv %s135_s13  ;;  %s141_s17 = sshra.s32 %s475_s21, 7 }
  0x1c   :  { %v129_v9 = vsel %vm128_vm1, %v125_v6, 0.0  ;;  %v134_v10 = vld [vmem:[%s133_s16] sm:$0x1]  ;;  %vm137_vm2 = vcmp.eq.s32.totalorder %v485_v2, %v136_v8  ;;  %s142_s19 = scalar_lea.vmem %s748_s1, %s141_s17  ;;  %s144_s29 = sand.u32 127, %s475_s21 }
  0x1d   :  { %v130_v11 = vadd.f32 %v129_v9, %v120_v5  ;;  %v138_v12 = vsel %vm137_vm2, %v134_v10, 0.0  ;;  %v143_v13 = vld [vmem:[%s142_s19] sm:$0x1]  ;;  %v145_v14 = vstv %s144_s29  ;;  %s32_s20 = sshra.s32 %s477_s0, 7  ;;  %s35_s30 = sand.u32 127, %s477_s0 }
  0x1e   :  { %vm146_vm3 = vcmp.eq.s32.totalorder %v485_v2, %v145_v14  ;;  %s33_s6 = scalar_lea.vmem %s748_s1, %s32_s20  ;;  %v36_v15 = vstv %s35_s30  ;;  %s41_s7 = sshra.s32 %s479_s22, 7 }
  0x1f   :  { %v139_v16 = vadd.f32 %v138_v12, %v130_v11  ;;  %v147_v17 = vsel %vm146_vm3, %v143_v13, 0.0  ;;  %v34_v18 = vld [vmem:[%s33_s6] sm:$0x1]  ;;  %vm37_vm4 = vcmp.eq.s32.totalorder %v485_v2, %v36_v15  ;;  %s42_s9 = scalar_lea.vmem %s748_s1, %s41_s7  ;;  %s44_s0 = sand.u32 127, %s479_s22 }
  0x20   :  { %v38_v19 = vsel %vm37_vm4, %v34_v18, 0.0  ;;  %v43_v20 = vld [vmem:[%s42_s9] sm:$0x1]  ;;  %v45_v21 = vstv %s44_s0  ;;  %s50_s10 = sshra.s32 %s481_s23, 7  ;;  %s53_s11 = sand.u32 127, %s481_s23 }
  0x21   :  { %v148_v22 = vadd.f32 %v147_v17, %v139_v16  ;;  %vm46_vm6 = vcmp.eq.s32.totalorder %v485_v2, %v45_v21  ;;  %s51_s14 = scalar_lea.vmem %s748_s1, %s50_s10  ;;  %v54_v23 = vstv %s53_s11  ;;  %s59_s15 = sshra.s32 %s483_s24, 7 }
  0x22   :  { %v47_v24 = vsel %vm46_vm6, %v43_v20, 0.0  ;;  %v52_v25 = vld [vmem:[%s51_s14] sm:$0x1]  ;;  %vm55_vm7 = vcmp.eq.s32.totalorder %v485_v2, %v54_v23  ;;  %s60_s23 = scalar_lea.vmem %s748_s1, %s59_s15  ;;  %s62_s17 = sand.u32 127, %s483_s24 }
  0x23   :  { %v149_v26 = vsel %vm67_vm5, %v148_v22, 0.0  ;;  %v48_v27 = vadd.f32 %v47_v24, %v38_v19  ;;  %v56_v28 = vsel %vm55_vm7, %v52_v25, 0.0  ;;  %v61_v29 = vld [vmem:[%s60_s23] sm:$0x1]  ;;  %v63_v30 = vstv %s62_s17  ;;  %s154_s18 = sshra.s32 %s487_s25, 7  ;;  %s157_s2 = sand.u32 127, %s487_s25 }
  0x24   :  { %150 = vadd.xlane.f32.xlu1 %v149_v26  ;;  %vm64_vm8 = vcmp.eq.s32.totalorder %v485_v2, %v63_v30  ;;  %s155_s20 = scalar_lea.vmem %s748_s1, %s154_s18  ;;  %v158_v31 = vstv %s157_s2  ;;  %s163_s24 = sshra.s32 %s489_s26, 7 }
  0x25   :  { %v57_v32 = vadd.f32 %v56_v28, %v48_v27  ;;  %v65_v33 = vsel %vm64_vm8, %v61_v29, 0.0  ;;  %v156_v34 = vld [vmem:[%s155_s20] sm:$0x1]  ;;  %vm159_vm9 = vcmp.eq.s32.totalorder %v485_v2, %v158_v31  ;;  %s164_s25 = scalar_lea.vmem %s748_s1, %s163_s24  ;;  %s166_s5 = sand.u32 127, %s489_s26 }
  0x26   :  { %v160_v35 = vsel %vm159_vm9, %v156_v34, 0.0  ;;  %v165_v36 = vld [vmem:[%s164_s25] sm:$0x1]  ;;  %v167_v37 = vstv %s166_s5  ;;  %s172_s6 = sshra.s32 %s491_s27, 7  ;;  %s175_s7 = sand.u32 127, %s491_s27 }
  0x27   :  { %v66_v38 = vadd.f32 %v65_v33, %v57_v32  ;;  %vm168_vm10 = vcmp.eq.s32.totalorder %v485_v2, %v167_v37  ;;  %s173_s9 = scalar_lea.vmem %s748_s1, %s172_s6  ;;  %v176_v39 = vstv %s175_s7  ;;  %s181_s0 = sshra.s32 %s493_s28, 7 }
  0x28   :  { %v169_v40 = vsel %vm168_vm10, %v165_v36, 0.0  ;;  %v174_v41 = vld [vmem:[%s173_s9] sm:$0x1]  ;;  %vm177_vm11 = vcmp.eq.s32.totalorder %v485_v2, %v176_v39  ;;  %s182_s11 = scalar_lea.vmem %s748_s1, %s181_s0  ;;  %s184_s12 = sand.u32 127, %s493_s28 }
  0x29   :  { %v68_v42 = vsel %vm67_vm5, %v66_v38, 0.0  ;;  %v170_v43 = vadd.f32 %v169_v40, %v160_v35  ;;  %v178_v44 = vsel %vm177_vm11, %v174_v41, 0.0  ;;  %v183_v45 = vld [vmem:[%s182_s11] sm:$0x1]  ;;  %v185_v46 = vstv %s184_s12  ;;  %s404_s27 = sld [smem:[#allocation3 + $0x4]]  ;;  %s405_s13 = sld [smem:[#allocation3 + $0x5]] }
  0x2a   :  { %69 = vadd.xlane.f32.xlu0 %v68_v42  ;;  %vm186_vm12 = vcmp.eq.s32.totalorder %v485_v2, %v185_v46  ;;  %s563_s14 = sld [smem:[#allocation3 + $0x6]]  ;;  %s565_s15 = sld [smem:[#allocation3 + $0x7]] }
  0x2b   :  { %v179_v47 = vadd.f32 %v178_v44, %v170_v43  ;;  %v187_v48 = vsel %vm186_vm12, %v183_v45, 0.0  ;;  %s567_s22 = sld [smem:[#allocation3 + $0x14]]  ;;  %s569_s28 = sld [smem:[#allocation3 + $0x15]] }
  0x2c   :  { %s571_s16 = sld [smem:[#allocation3 + $0x16]]  ;;  %s573_s23 = sld [smem:[#allocation3 + $0x17]] }
  0x2d   :  { %v188_v49 = vadd.f32 %v187_v48, %v179_v47  ;;  %s575_s17 = sld [smem:[#allocation3 + $0x10]]  ;;  %s577_s18 = sld [smem:[#allocation3 + $0x11]] }
  0x2e   :  { %s579_s2 = sld [smem:[#allocation3 + $0x12]] }
  0x2f   :  { %v189_v50 = vsel %vm67_vm5, %v188_v49, 0.0  ;;  %s74_s19 = sshra.s32 %s404_s27, 7  ;;  %s77_s29 = sand.u32 127, %s404_s27 }
  0x30   :  { %190 = vadd.xlane.f32.xlu1 %v189_v50  ;;  %s75_s30 = scalar_lea.vmem %s748_s1, %s74_s19  ;;  %v78_v51 = vstv %s77_s29  ;;  %s83_s4 = sshra.s32 %s405_s13, 7 }
  0x31   :  { %v76_v52 = vld [vmem:[%s75_s30] sm:$0x1]  ;;  %vm79_vm13 = vcmp.eq.s32.totalorder %v485_v2, %v78_v51  ;;  %s84_s6 = scalar_lea.vmem %s748_s1, %s83_s4  ;;  %s86_s7 = sand.u32 127, %s405_s13 }
  0x32   :  { %v80_v53 = vsel %vm79_vm13, %v76_v52, 0.0  ;;  %v85_v54 = vld [vmem:[%s84_s6] sm:$0x1]  ;;  %v87_v55 = vstv %s86_s7  ;;  %s92_s21 = sshra.s32 %s563_s14, 7  ;;  %s95_s8 = sand.u32 127, %s563_s14 }
  0x33   :  { %vm88_vm14 = vcmp.eq.s32.totalorder %v485_v2, %v87_v55  ;;  %s93_s10 = scalar_lea.vmem %s748_s1, %s92_s21  ;;  %v96_v56 = vstv %s95_s8  ;;  %s101_s26 = sshra.s32 %s565_s15, 7 }
  0x34   :  { %v89_v57 = vsel %vm88_vm14, %v85_v54, 0.0  ;;  %v94_v58 = vld [vmem:[%s93_s10] sm:$0x1]  ;;  %vm97_vm15 = vcmp.eq.s32.totalorder %v485_v2, %v96_v56  ;;  %s102_s27 = scalar_lea.vmem %s748_s1, %s101_s26  ;;  %s104_s13 = sand.u32 127, %s565_s15 }
  0x35   :  { %v90_v59 = vadd.f32 %v89_v57, %v80_v53  ;;  %v98_v60 = vsel %vm97_vm15, %v94_v58, 0.0  ;;  %v103_v61 = vld [vmem:[%s102_s27] sm:$0x1]  ;;  %v105_v62 = vstv %s104_s13  ;;  %s234_s14 = sshra.s32 %s567_s22, 7  ;;  %s237_s19 = sand.u32 127, %s567_s22 }
  0x36   :  { %vm106_vm0 = vcmp.eq.s32.totalorder %v485_v2, %v105_v62  ;;  %s235_s24 = scalar_lea.vmem %s748_s1, %s234_s14  ;;  %v238_v63 = vstv %s237_s19  ;;  %s243_s30 = sshra.s32 %s569_s28, 7 }
  0x37   :  { %v99_v0 = vadd.f32 %v98_v60, %v90_v59  ;;  %v107_v1 = vsel %vm106_vm0, %v103_v61, 0.0  ;;  %v236_v3 = vld [vmem:[%s235_s24] sm:$0x1]  ;;  %vm239_vm1 = vcmp.eq.s32.totalorder %v485_v2, %v238_v63  ;;  %s244_s25 = scalar_lea.vmem %s748_s1, %s243_s30  ;;  %s246_s22 = sand.u32 127, %s569_s28 }
  0x38   :  { %v240_v4 = vsel %vm239_vm1, %v236_v3, 0.0  ;;  %v245_v5 = vld [vmem:[%s244_s25] sm:$0x1]  ;;  %v247_v6 = vstv %s246_s22  ;;  %s252_s5 = sshra.s32 %s571_s16, 7  ;;  %s255_s6 = sand.u32 127, %s571_s16 }
  0x39   :  { %v108_v7 = vadd.f32 %v107_v1, %v99_v0  ;;  %vm248_vm2 = vcmp.eq.s32.totalorder %v485_v2, %v247_v6  ;;  %s253_s8 = scalar_lea.vmem %s748_s1, %s252_s5  ;;  %v256_v8 = vstv %s255_s6  ;;  %s261_s9 = sshra.s32 %s573_s23, 7 }
  0x3a   :  { %v249_v9 = vsel %vm248_vm2, %v245_v5, 0.0  ;;  %v254_v10 = vld [vmem:[%s253_s8] sm:$0x1]  ;;  %vm257_vm3 = vcmp.eq.s32.totalorder %v485_v2, %v256_v8  ;;  %s262_s16 = scalar_lea.vmem %s748_s1, %s261_s9  ;;  %s264_s10 = sand.u32 127, %s573_s23  ;;  %vm71_vm2 = vcmask 0  }
  0x3b   :  { %v109_v11 = vsel %vm67_vm5, %v108_v7, 0.0  ;;  %v250_v12 = vadd.f32 %v249_v9, %v240_v4  ;;  %v258_v13 = vsel %vm257_vm3, %v254_v10, 0.0  ;;  %v263_v14 = vld [vmem:[%s262_s16] sm:$0x1]  ;;  %v265_v15 = vstv %s264_s10  ;;  %s194_s26 = sshra.s32 %s575_s17, 7  ;;  %s197_s11 = sand.u32 127, %s575_s17 }
  0x3c   :  { %110 = vadd.xlane.f32.xlu0 %v109_v11  ;;  %vm266_vm4 = vcmp.eq.s32.totalorder %v485_v2, %v265_v15  ;;  %s195_s13 = scalar_lea.vmem %s748_s1, %s194_s26  ;;  %v198_v16 = vstv %s197_s11  ;;  %s203_s23 = sshra.s32 %s577_s18, 7 }
  0x3d   :  { %v259_v17 = vadd.f32 %v258_v13, %v250_v12  ;;  %v267_v18 = vsel %vm266_vm4, %v263_v14, 0.0  ;;  %v196_v19 = vld [vmem:[%s195_s13] sm:$0x1]  ;;  %vm199_vm6 = vcmp.eq.s32.totalorder %v485_v2, %v198_v16  ;;  %s204_s29 = scalar_lea.vmem %s748_s1, %s203_s23  ;;  %s206_s17 = sand.u32 127, %s577_s18 }
  0x3e   :  { %v200_v20 = vsel %vm199_vm6, %v196_v19, 0.0  ;;  %v205_v21 = vld [vmem:[%s204_s29] sm:$0x1]  ;;  %v207_v22 = vstv %s206_s17  ;;  %s212_s20 = sshra.s32 %s579_s2, 7  ;;  %s215_s24 = sand.u32 127, %s579_s2 }
  0x3f   :  { %v268_v23 = vadd.f32 %v267_v18, %v259_v17  ;;  %vm208_vm7 = vcmp.eq.s32.totalorder %v485_v2, %v207_v22  ;;  %s213_s4 = scalar_lea.vmem %s748_s1, %s212_s20  ;;  %v216_v24 = vstv %s215_s24  ;;  %s419_s25 = sld [smem:[#allocation3 + $0x13]]  ;;  %v432_v12 = vld [vmem:[#allocation2] ss:$0 sm:$0xff] }
  0x40   :  { %v209_v25 = vsel %vm208_vm7, %v205_v21, 0.0  ;;  %v214_v26 = vld [vmem:[%s213_s4] sm:$0x1]  ;;  %vm217_vm8 = vcmp.eq.s32.totalorder %v485_v2, %v216_v24  ;;  %s428_s22 = sld [smem:[#allocation3 + $0x1c]]  ;;  %s429_s18 = sld [smem:[#allocation3 + $0x1d]] }
  0x41   :  { %v269_v27 = vsel %vm67_vm5, %v268_v23, 0.0  ;;  %v210_v28 = vadd.f32 %v209_v25, %v200_v20  ;;  %s646_s5 = sld [smem:[#allocation3 + $0x1e]]  ;;  %v218_v29 = vsel %vm217_vm8, %v214_v26, 0.0  ;;  %s648_s2 = sld [smem:[#allocation3 + $0x1f]] }
  0x42   :  { %270 = vadd.xlane.f32.xlu1 %v269_v27  ;;  %s650_s6 = sld [smem:[#allocation3 + $0x18]]  ;;  %s652_s7 = sld [smem:[#allocation3 + $0x19]] }
  0x43   :  { %s654_s21 = sld [smem:[#allocation3 + $0x1a]]  ;;  %s656_s8 = sld [smem:[#allocation3 + $0x1b]]  ;;  %v219_v30 = vadd.f32 %v218_v29, %v210_v28 }
  0x45   :  { %s221_s9 = sshra.s32 %s419_s25, 7  ;;  %s224_s28 = sand.u32 127, %s419_s25 }
  0x46   :  { %s222_s10 = scalar_lea.vmem %s748_s1, %s221_s9  ;;  %v225_v31 = vstv %s224_s28  ;;  %s314_s26 = sshra.s32 %s428_s22, 7 }
  0x47   :  { %v223_v32 = vld [vmem:[%s222_s10] sm:$0x1]  ;;  %vm226_vm9 = vcmp.eq.s32.totalorder %v485_v2, %v225_v31  ;;  %s315_s27 = scalar_lea.vmem %s748_s1, %s314_s26  ;;  %s317_s13 = sand.u32 127, %s428_s22 }
  0x48   :  { %v227_v33 = vsel %vm226_vm9, %v223_v32, 0.0  ;;  %v316_v34 = vld [vmem:[%s315_s27] sm:$0x1]  ;;  %v318_v35 = vstv %s317_s13  ;;  %s323_s23 = sshra.s32 %s429_s18, 7  ;;  %s326_s14 = sand.u32 127, %s429_s18 }
  0x49   :  { %v228_v36 = vadd.f32 %v227_v33, %v219_v30  ;;  %vm319_vm10 = vcmp.eq.s32.totalorder %v485_v2, %v318_v35  ;;  %s324_s17 = scalar_lea.vmem %s748_s1, %s323_s23  ;;  %v327_v37 = vstv %s326_s14  ;;  %s332_s20 = sshra.s32 %s646_s5, 7 }
  0x4a   :  { %v320_v38 = vsel %vm319_vm10, %v316_v34, 0.0  ;;  %v325_v39 = vld [vmem:[%s324_s17] sm:$0x1]  ;;  %vm328_vm11 = vcmp.eq.s32.totalorder %v485_v2, %v327_v37  ;;  %s333_s15 = scalar_lea.vmem %s748_s1, %s332_s20  ;;  %s335_s4 = sand.u32 127, %s646_s5 }
  0x4b   :  { %v229_v40 = vsel %vm67_vm5, %v228_v36, 0.0  ;;  %v329_v41 = vsel %vm328_vm11, %v325_v39, 0.0  ;;  %v334_v42 = vld [vmem:[%s333_s15] sm:$0x1]  ;;  %v336_v43 = vstv %s335_s4  ;;  %s341_s25 = sshra.s32 %s648_s2, 7  ;;  %s344_s22 = sand.u32 127, %s648_s2 }
  0x4c   :  { %230 = vadd.xlane.f32.xlu0 %v229_v40  ;;  %v330_v44 = vadd.f32 %v329_v41, %v320_v38  ;;  %vm337_vm12 = vcmp.eq.s32.totalorder %v485_v2, %v336_v43  ;;  %s342_s28 = scalar_lea.vmem %s748_s1, %s341_s25  ;;  %v345_v45 = vstv %s344_s22  ;;  %s274_s5 = sshra.s32 %s650_s6, 7 }
  0x4d   :  { %v338_v46 = vsel %vm337_vm12, %v334_v42, 0.0  ;;  %v343_v47 = vld [vmem:[%s342_s28] sm:$0x1]  ;;  %vm346_vm13 = vcmp.eq.s32.totalorder %v485_v2, %v345_v45  ;;  %s275_s2 = scalar_lea.vmem %s748_s1, %s274_s5  ;;  %s277_s10 = sand.u32 127, %s650_s6 }
  0x4e   :  { %v339_v48 = vadd.f32 %v338_v46, %v330_v44  ;;  %v347_v49 = vsel %vm346_vm13, %v343_v47, 0.0  ;;  %v276_v50 = vld [vmem:[%s275_s2] sm:$0x1]  ;;  %v278_v51 = vstv %s277_s10  ;;  %s283_s26 = sshra.s32 %s652_s7, 7  ;;  %s286_s11 = sand.u32 127, %s652_s7 }
  0x4f   :  { %vm279_vm14 = vcmp.eq.s32.totalorder %v485_v2, %v278_v51  ;;  %s284_s13 = scalar_lea.vmem %s748_s1, %s283_s26  ;;  %v287_v52 = vstv %s286_s11  ;;  %s292_s23 = sshra.s32 %s654_s21, 7 }
  0x50   :  { %v348_v53 = vadd.f32 %v347_v49, %v339_v48  ;;  %v280_v54 = vsel %vm279_vm14, %v276_v50, 0.0  ;;  %v285_v55 = vld [vmem:[%s284_s13] sm:$0x1]  ;;  %vm288_vm15 = vcmp.eq.s32.totalorder %v485_v2, %v287_v52  ;;  %s293_s19 = scalar_lea.vmem %s748_s1, %s292_s23  ;;  %s295_s29 = sand.u32 127, %s654_s21 }
  0x51   :  { %v289_v56 = vsel %vm288_vm15, %v285_v55, 0.0  ;;  %v294_v57 = vld [vmem:[%s293_s19] sm:$0x1]  ;;  %v296_v58 = vstv %s295_s29  ;;  %s301_s7 = sshra.s32 %s656_s8, 7  ;;  %s304_s17 = sand.u32 127, %s656_s8 }
  0x52   :  { %v349_v59 = vsel %vm67_vm5, %v348_v53, 0.0  ;;  %v290_v60 = vadd.f32 %v289_v56, %v280_v54  ;;  %vm297_vm0 = vcmp.eq.s32.totalorder %v485_v2, %v296_v58  ;;  %s302_s30 = scalar_lea.vmem %s748_s1, %s301_s7  ;;  %v305_v61 = vstv %s304_s17 }
  0x53   :  { %350 = vadd.xlane.f32.xlu1 %v349_v59  ;;  %v298_v62 = vsel %vm297_vm0, %v294_v57, 0.0  ;;  %v303_v63 = vld [vmem:[%s302_s30] sm:$0x1]  ;;  %vm306_vm1 = vcmp.eq.s32.totalorder %v485_v2, %v305_v61 }
  0x54   :  { %v299_v0 = vadd.f32 %v298_v62, %v290_v60  ;;  %v307_v1 = vsel %vm306_vm1, %v303_v63, 0.0 }
  0x56   :  { %v308_v3 = vadd.f32 %v307_v1, %v299_v0 }
  0x58   :  { %v309_v4 = vsel %vm67_vm5, %v308_v3, 0.0  ;;  %vm362_vm5 = vcmask 7168  }
  0x59   :  { %310 = vadd.xlane.f32.xlu0 %v309_v4 }
  0xb1   :  { %v151_v5 = vpop.xlane.xlu1 %150 }
  0xb2   :  { %152 = vst.msk [vmem:[%s750_s3 + $0x2] sm:$0x1] %vm71_vm2, %v151_v5 }
  0xb7   :  { %v70_v6 = vpop.xlane.xlu0 %69 }
  0xb8   :  { %72 = vst.msk [vmem:[%s750_s3] sm:$0x1] %vm71_vm2, %v70_v6 }
  0xbd   :  { %v191_v2 = vpop.xlane.xlu1 %190 }
  0xbe   :  { %192 = vst.msk [vmem:[%s750_s3 + $0x3] sm:$0x1] %vm71_vm2, %v191_v2 }
  0xc9   :  { %v111_v7 = vpop.xlane.xlu0 %110 }
  0xca   :  { %112 = vst.msk [vmem:[%s750_s3 + $0x1] sm:$0x1] %vm71_vm2, %v111_v7 }
  0xcf   :  { %v271_v8 = vpop.xlane.xlu1 %270 }
  0xd0   :  { %272 = vst.msk [vmem:[%s750_s3 + $0x5] sm:$0x1] %vm71_vm2, %v271_v8 }
  0xd9   :  { %v231_v9 = vpop.xlane.xlu0 %230 }
  0xda   :  { %232 = vst.msk [vmem:[%s750_s3 + $0x4] sm:$0x1] %vm71_vm2, %v231_v9 }
  0xe0   :  { %v351_v10 = vpop.xlane.xlu1 %350 }
  0xe1   :  { %352 = vst.msk [vmem:[%s750_s3 + $0x7] sm:$0x1] %vm71_vm2, %v351_v10 }
  0xe6   :  { %v311_v11 = vpop.xlane.xlu0 %310 }
  0xe7   :  { %312 = vst.msk [vmem:[%s750_s3 + $0x6] sm:$0x1] %vm71_vm2, %v311_v11 }
  0xee   :  { %v353_v13 = vld [vmem:[%s750_s3] sm:$0xff] }
  0xef   :  { %v361_v14 = vadd.f32 %v432_v12, %v353_v13 }
  0xf1   :  { %363 = vst.msk [vmem:[%s750_s3] sm:$0xff] %vm362_vm5, %v361_v14 }
  0xf2   :  { %368 = vsyncpa [#allocation4], 1 }

</bundles_post_ra>
